<compile_context>
chip_gen: v6e
topology: v6e:2x2x1
jax: 0.10.0
libtpu: 0.0.40
codegen_flags: <defaults>
</compile_context>

<pallas_src>
import functools

import jax
import jax.numpy as jnp
from jax.experimental import pallas as pl
from jax.experimental.pallas import tpu as pltpu

BN_EPS = 1e-5
PAD = 128  # lane-dense padded width for hidden / output dims


def _bn_train_fused(h, gamma, beta, denom, rmask):
    """BatchNorm1d (training): single-pass batch stats + fused scale/shift.

    h is f32 [Bp, PAD]; gamma/beta are f32 [1, PAD]. Padded columns have
    gamma=beta=0 and h=0, so they stay exactly 0.  `rmask` (or None) masks
    padded batch rows out of the statistics; `denom` is the true batch size.
    """
    hm = h if rmask is None else h * rmask
    s1 = jnp.sum(hm, axis=0, keepdims=True)
    s2 = jnp.sum(hm * hm, axis=0, keepdims=True)
    inv_n = 1.0 / denom
    mean = s1 * inv_n
    var = jnp.maximum(s2 * inv_n - mean * mean, 0.0)
    inv = jax.lax.rsqrt(var + BN_EPS)
    scale = gamma * inv
    shift = beta - mean * scale
    return h * scale + shift


def mlp_kernel(x_ref, w1_ref, w2_ref, w3_ref, vec_ref, o_ref, *, true_b):
    x = x_ref[...]            # bf16 [Bp, num_inputs]
    vec = vec_ref[...]        # f32  [8, PAD]  (packed small vectors)
    b1, g1, be1 = vec[0:1, :], vec[1:2, :], vec[2:3, :]
    b2, g2, be2 = vec[3:4, :], vec[4:5, :], vec[5:6, :]
    b3 = vec[6:7, :]

    bp = x.shape[0]
    if bp != true_b:
        row = jax.lax.broadcasted_iota(jnp.int32, (bp, 1), 0)
        rmask = (row < true_b).astype(jnp.float32)
    else:
        rmask = None

    # lin1: Linear -> ReLU -> BatchNorm1d
    h1 = jnp.dot(x, w1_ref[...], preferred_element_type=jnp.float32) + b1
    h1 = jnp.maximum(h1, 0.0)
    h1 = _bn_train_fused(h1, g1, be1, true_b, rmask)

    # lin2: Linear -> ReLU -> BatchNorm1d
    h2 = jnp.dot(h1.astype(jnp.bfloat16), w2_ref[...],
                 preferred_element_type=jnp.float32) + b2
    h2 = jnp.maximum(h2, 0.0)
    h2 = _bn_train_fused(h2, g2, be2, true_b, rmask)

    # lin3: plain Linear
    out = jnp.dot(h2.astype(jnp.bfloat16), w3_ref[...],
                  preferred_element_type=jnp.float32) + b3
    o_ref[...] = out.astype(o_ref.dtype)


def init_params(key, num_inputs, num_hidden, num_outputs):
    """PyTorch-style init; returns unpadded f32 params."""
    ks = jax.random.split(key, 3)

    def lin(k, fan_in, fan_out):
        bound = 1.0 / jnp.sqrt(fan_in)
        kw, kb = jax.random.split(k)
        w = jax.random.uniform(kw, (fan_in, fan_out), jnp.float32, -bound, bound)
        b = jax.random.uniform(kb, (1, fan_out), jnp.float32, -bound, bound)
        return w, b

    w1, b1 = lin(ks[0], num_inputs, num_hidden)
    w2, b2 = lin(ks[1], num_hidden, num_hidden)
    w3, b3 = lin(ks[2], num_hidden, num_outputs)
    # BatchNorm1d affine params (PyTorch default init: gamma=1, beta=0)
    g1 = jnp.ones((1, num_hidden), jnp.float32)
    be1 = jnp.zeros((1, num_hidden), jnp.float32)
    g2 = jnp.ones((1, num_hidden), jnp.float32)
    be2 = jnp.zeros((1, num_hidden), jnp.float32)
    return (w1, b1, g1, be1, w2, b2, g2, be2, w3, b3)


def prepare_params(params, pad=PAD):
    """Pad hidden/output dims to `pad`, cast weights to bf16, pack vectors."""
    (w1, b1, g1, be1, w2, b2, g2, be2, w3, b3) = params
    num_outputs = w3.shape[1]

    def pad_cols(w):
        return jnp.pad(w, ((0, 0), (0, pad - w.shape[1])))

    def pad_both(w):
        return jnp.pad(w, ((0, pad - w.shape[0]), (0, pad - w.shape[1])))

    def vrow(v):
        v = v.reshape(1, -1)
        return jnp.pad(v, ((0, 0), (0, pad - v.shape[1])))

    w1p = pad_cols(w1).astype(jnp.bfloat16)   # [num_inputs, PAD]
    w2p = pad_both(w2).astype(jnp.bfloat16)   # [PAD, PAD]
    w3p = pad_both(w3).astype(jnp.bfloat16)   # [PAD, PAD]
    # Packed small vectors (8 rows = one f32 vreg): zero pad cols keep padded
    # lanes at exactly 0 through ReLU/BN/linear.
    vecs = jnp.concatenate(
        [vrow(b1), vrow(g1), vrow(be1),
         vrow(b2), vrow(g2), vrow(be2),
         vrow(b3), jnp.zeros((1, pad), jnp.float32)], axis=0).astype(jnp.float32)
    return (w1p, w2p, w3p, vecs, num_outputs)


def model_forward(x_nchw, prepared):
    w1p, w2p, w3p, vecs, num_outputs = prepared
    B = x_nchw.shape[0]
    Bp = max(8, ((B + 7) // 8) * 8)          # sublane-aligned batch
    hp = w1p.shape[1]

    x_flat = x_nchw.reshape(B, -1).astype(jnp.bfloat16)   # Flatten + bf16 feed
    if Bp != B:
        x_flat = jnp.pad(x_flat, ((0, Bp - B), (0, 0)))

    vmem = pl.BlockSpec(memory_space=pltpu.MemorySpace.VMEM)
    out_pad = pl.pallas_call(
        functools.partial(mlp_kernel, true_b=B),
        out_shape=jax.ShapeDtypeStruct((Bp, hp), jnp.float32),
        in_specs=[vmem] * 5,
        out_specs=vmem,
    )(x_flat, w1p, w2p, w3p, vecs)
    return out_pad[:B, :num_outputs]


def _bn_ref(h, gamma, beta):
    mean = jnp.mean(h, axis=0, keepdims=True)
    var = jnp.mean((h - mean) ** 2, axis=0, keepdims=True)
    return (h - mean) * jax.lax.rsqrt(var + BN_EPS) * gamma + beta


def reference_forward(x_nchw, params):
    """Pure-JAX reference, with matmul inputs cast to bf16 to match the kernel."""
    (w1, b1, g1, be1, w2, b2, g2, be2, w3, b3) = params
    x = x_nchw.reshape(x_nchw.shape[0], -1)

    def mm(a, w):
        return jnp.dot(a.astype(jnp.bfloat16), w.astype(jnp.bfloat16),
                       preferred_element_type=jnp.float32)

    h1 = _bn_ref(jnp.maximum(mm(x, w1) + b1, 0.0), g1, be1)
    h2 = _bn_ref(jnp.maximum(mm(h1, w2) + b2, 0.0), g2, be2)
    return mm(h2, w3) + b3


if __name__ == "__main__":
    key = jax.random.PRNGKey(0)
    kx, kp = jax.random.split(key)

    B, C, H, W = 8, 4, 16, 16
    num_inputs = C * H * W        # 1024
    num_hidden = 32
    num_outputs = 10

    x = jax.random.normal(kx, (B, C, H, W), jnp.float32)
    params = init_params(kp, num_inputs, num_hidden, num_outputs)
    prepared = prepare_params(params)

    out = model_forward(x, prepared)
    jax.block_until_ready(out)

    ref = reference_forward(x, params)
    assert out.shape == (B, num_outputs)
    assert jnp.allclose(out, ref, atol=1e-2, rtol=1e-2), (
        float(jnp.max(jnp.abs(out - ref))))
    print("KERNEL_OK")
</pallas_src>

<mosaic_0001>
module attributes {stable_mosaic.version = 11 : i64} {
  func.func @mlp_kernel(%arg0: memref<8x1024xbf16, #tpu.memory_space<vmem>>, %arg1: memref<1024x128xbf16, #tpu.memory_space<vmem>>, %arg2: memref<128x128xbf16, #tpu.memory_space<vmem>>, %arg3: memref<128x128xbf16, #tpu.memory_space<vmem>>, %arg4: memref<8x128xf32, #tpu.memory_space<vmem>>, %arg5: memref<8x128xf32, #tpu.memory_space<vmem>>) attributes {dimension_semantics = [], scalar_prefetch = 0 : i64, scratch_operands = 0 : i64, tpu.core_type = #tpu.core_type<tc>} {
    %c0 = arith.constant 0 : index
    %c0_0 = arith.constant 0 : index
    %0 = vector.load %arg0[%c0, %c0_0] : memref<8x1024xbf16, #tpu.memory_space<vmem>>, vector<8x1024xbf16>
    %c0_1 = arith.constant 0 : index
    %c0_2 = arith.constant 0 : index
    %1 = vector.load %arg4[%c0_1, %c0_2] : memref<8x128xf32, #tpu.memory_space<vmem>>, vector<8x128xf32>
    %2 = vector.extract_strided_slice %1 {offsets = [0, 0], sizes = [1, 128], strides = [1, 1]} : vector<8x128xf32> to vector<1x128xf32>
    %3 = vector.extract_strided_slice %1 {offsets = [1, 0], sizes = [1, 128], strides = [1, 1]} : vector<8x128xf32> to vector<1x128xf32>
    %4 = vector.extract_strided_slice %1 {offsets = [2, 0], sizes = [1, 128], strides = [1, 1]} : vector<8x128xf32> to vector<1x128xf32>
    %5 = vector.extract_strided_slice %1 {offsets = [3, 0], sizes = [1, 128], strides = [1, 1]} : vector<8x128xf32> to vector<1x128xf32>
    %6 = vector.extract_strided_slice %1 {offsets = [4, 0], sizes = [1, 128], strides = [1, 1]} : vector<8x128xf32> to vector<1x128xf32>
    %7 = vector.extract_strided_slice %1 {offsets = [5, 0], sizes = [1, 128], strides = [1, 1]} : vector<8x128xf32> to vector<1x128xf32>
    %8 = vector.extract_strided_slice %1 {offsets = [6, 0], sizes = [1, 128], strides = [1, 1]} : vector<8x128xf32> to vector<1x128xf32>
    %c0_3 = arith.constant 0 : index
    %c0_4 = arith.constant 0 : index
    %9 = vector.load %arg1[%c0_3, %c0_4] : memref<1024x128xbf16, #tpu.memory_space<vmem>>, vector<1024x128xbf16>
    %cst = arith.constant dense<0.000000e+00> : vector<8x128xf32>
    %10 = tpu.matmul %0, %9, %cst {dimension_numbers = #tpu.dot_dimension_numbers<[1], [0], [0], [1], [0, 0, 1, 1], [], []>} : vector<8x1024xbf16>, vector<1024x128xbf16>, vector<8x128xf32> -> vector<8x128xf32>
    %11 = vector.broadcast %2 : vector<1x128xf32> to vector<8x128xf32>
    %12 = arith.addf %10, %11 : vector<8x128xf32>
    %cst_5 = arith.constant 0.000000e+00 : f32
    %13 = vector.broadcast %cst_5 : f32 to vector<8x128xf32>
    %14 = arith.maximumf %12, %13 : vector<8x128xf32>
    %cst_6 = arith.constant dense<0.000000e+00> : vector<128xf32>
    %15 = vector.multi_reduction <add>, %14, %cst_6 [0] : vector<8x128xf32> to vector<128xf32>
    %16 = vector.shape_cast %15 : vector<128xf32> to vector<1x128xf32>
    %17 = arith.mulf %14, %14 : vector<8x128xf32>
    %cst_7 = arith.constant dense<0.000000e+00> : vector<128xf32>
    %18 = vector.multi_reduction <add>, %17, %cst_7 [0] : vector<8x128xf32> to vector<128xf32>
    %19 = vector.shape_cast %18 : vector<128xf32> to vector<1x128xf32>
    %cst_8 = arith.constant 1.250000e-01 : f32
    %20 = vector.broadcast %cst_8 : f32 to vector<1x128xf32>
    %21 = arith.mulf %16, %20 : vector<1x128xf32>
    %cst_9 = arith.constant 1.250000e-01 : f32
    %22 = vector.broadcast %cst_9 : f32 to vector<1x128xf32>
    %23 = arith.mulf %19, %22 : vector<1x128xf32>
    %24 = arith.mulf %21, %21 : vector<1x128xf32>
    %25 = arith.subf %23, %24 : vector<1x128xf32>
    %cst_10 = arith.constant 0.000000e+00 : f32
    %26 = vector.broadcast %cst_10 : f32 to vector<1x128xf32>
    %27 = arith.maximumf %25, %26 : vector<1x128xf32>
    %cst_11 = arith.constant 9.99999974E-6 : f32
    %28 = vector.broadcast %cst_11 : f32 to vector<1x128xf32>
    %29 = arith.addf %27, %28 : vector<1x128xf32>
    %30 = math.rsqrt %29 : vector<1x128xf32>
    %31 = arith.mulf %3, %30 : vector<1x128xf32>
    %32 = arith.mulf %21, %31 : vector<1x128xf32>
    %33 = arith.subf %4, %32 : vector<1x128xf32>
    %34 = vector.broadcast %31 : vector<1x128xf32> to vector<8x128xf32>
    %35 = arith.mulf %14, %34 : vector<8x128xf32>
    %36 = vector.broadcast %33 : vector<1x128xf32> to vector<8x128xf32>
    %37 = arith.addf %35, %36 : vector<8x128xf32>
    %38 = arith.truncf %37 : vector<8x128xf32> to vector<8x128xbf16>
    %c0_12 = arith.constant 0 : index
    %c0_13 = arith.constant 0 : index
    %39 = vector.load %arg2[%c0_12, %c0_13] : memref<128x128xbf16, #tpu.memory_space<vmem>>, vector<128x128xbf16>
    %cst_14 = arith.constant dense<0.000000e+00> : vector<8x128xf32>
    %40 = tpu.matmul %38, %39, %cst_14 {dimension_numbers = #tpu.dot_dimension_numbers<[1], [0], [0], [1], [0, 0, 1, 1], [], []>} : vector<8x128xbf16>, vector<128x128xbf16>, vector<8x128xf32> -> vector<8x128xf32>
    %41 = vector.broadcast %5 : vector<1x128xf32> to vector<8x128xf32>
    %42 = arith.addf %40, %41 : vector<8x128xf32>
    %cst_15 = arith.constant 0.000000e+00 : f32
    %43 = vector.broadcast %cst_15 : f32 to vector<8x128xf32>
    %44 = arith.maximumf %42, %43 : vector<8x128xf32>
    %cst_16 = arith.constant dense<0.000000e+00> : vector<128xf32>
    %45 = vector.multi_reduction <add>, %44, %cst_16 [0] : vector<8x128xf32> to vector<128xf32>
    %46 = vector.shape_cast %45 : vector<128xf32> to vector<1x128xf32>
    %47 = arith.mulf %44, %44 : vector<8x128xf32>
    %cst_17 = arith.constant dense<0.000000e+00> : vector<128xf32>
    %48 = vector.multi_reduction <add>, %47, %cst_17 [0] : vector<8x128xf32> to vector<128xf32>
    %49 = vector.shape_cast %48 : vector<128xf32> to vector<1x128xf32>
    %cst_18 = arith.constant 1.250000e-01 : f32
    %50 = vector.broadcast %cst_18 : f32 to vector<1x128xf32>
    %51 = arith.mulf %46, %50 : vector<1x128xf32>
    %cst_19 = arith.constant 1.250000e-01 : f32
    %52 = vector.broadcast %cst_19 : f32 to vector<1x128xf32>
    %53 = arith.mulf %49, %52 : vector<1x128xf32>
    %54 = arith.mulf %51, %51 : vector<1x128xf32>
    %55 = arith.subf %53, %54 : vector<1x128xf32>
    %cst_20 = arith.constant 0.000000e+00 : f32
    %56 = vector.broadcast %cst_20 : f32 to vector<1x128xf32>
    %57 = arith.maximumf %55, %56 : vector<1x128xf32>
    %cst_21 = arith.constant 9.99999974E-6 : f32
    %58 = vector.broadcast %cst_21 : f32 to vector<1x128xf32>
    %59 = arith.addf %57, %58 : vector<1x128xf32>
    %60 = math.rsqrt %59 : vector<1x128xf32>
    %61 = arith.mulf %6, %60 : vector<1x128xf32>
    %62 = arith.mulf %51, %61 : vector<1x128xf32>
    %63 = arith.subf %7, %62 : vector<1x128xf32>
    %64 = vector.broadcast %61 : vector<1x128xf32> to vector<8x128xf32>
    %65 = arith.mulf %44, %64 : vector<8x128xf32>
    %66 = vector.broadcast %63 : vector<1x128xf32> to vector<8x128xf32>
    %67 = arith.addf %65, %66 : vector<8x128xf32>
    %68 = arith.truncf %67 : vector<8x128xf32> to vector<8x128xbf16>
    %c0_22 = arith.constant 0 : index
    %c0_23 = arith.constant 0 : index
    %69 = vector.load %arg3[%c0_22, %c0_23] : memref<128x128xbf16, #tpu.memory_space<vmem>>, vector<128x128xbf16>
    %cst_24 = arith.constant dense<0.000000e+00> : vector<8x128xf32>
    %70 = tpu.matmul %68, %69, %cst_24 {dimension_numbers = #tpu.dot_dimension_numbers<[1], [0], [0], [1], [0, 0, 1, 1], [], []>} : vector<8x128xbf16>, vector<128x128xbf16>, vector<8x128xf32> -> vector<8x128xf32>
    %71 = vector.broadcast %8 : vector<1x128xf32> to vector<8x128xf32>
    %72 = arith.addf %70, %71 : vector<8x128xf32>
    %c0_25 = arith.constant 0 : index
    %c0_26 = arith.constant 0 : index
    %73 = vector.load %arg5[%c0_25, %c0_26] : memref<8x128xf32, #tpu.memory_space<vmem>>, vector<8x128xf32>
    tpu.vector_store %arg5[%c0_25, %c0_26], %72 {strides = array<i32>} : memref<8x128xf32, #tpu.memory_space<vmem>>, vector<8x128xf32>,
    return
  }
}

</mosaic_0001>

<bundles_post_ra>
// kernel: tpu_custom_call.1
= control target key start
LH: loop header
LB: loop body
LE: loop exit
PB: predicated region body
PF: predicated region fallthrough
CT: control target
= control target key end

     0   :  { %10 = vsyncpa [#allocation3], 0  ;;  %s1672_s0 = inlined_call_operand.hbm [shape: bf16[8,1024], index: 0, kind: input, shape index: {}]   ;;  %s1673_s1 = inlined_call_operand.hbm [shape: bf16[1024,128], index: 1, kind: input, shape index: {}]   ;;  %s1674_s2 = inlined_call_operand.hbm [shape: bf16[128,128], index: 2, kind: input, shape index: {}]   ;;  %s1675_s3 = inlined_call_operand.hbm [shape: bf16[128,128], index: 3, kind: input, shape index: {}]   ;;  %s1676_s4 = inlined_call_operand.hbm [shape: f32[8,128], index: 4, kind: input, shape index: {}]   ;;  %s1677_s5 = inlined_call_operand.hbm [shape: f32[8,128], index: 5, kind: output, shape index: {}]  }
   0x1   :  { %11 = vsyncpa [#allocation6], 0 }
   0x2   :  { %12 = vsyncpa [#allocation9], 0 }
   0x3   :  { %13 = vsyncpa [#allocation4], 0  ;;  %s1569_s18 = smov [#allocation5]  }
   0x4   :  { %s29_s19 = sshll.u32 %s1569_s18, 4  ;;  %s30_s19 = int_to_ptr.vmem [resolvable:$true] %s29_s19 }
   0x5   :  { %s1449_s20 = scalar_lea.vmem %s30_s19, 8192  ;;  %p1454_p1 = scmp.lt.s32.totalorder %s30_s19, %s30_s19 }
   0x6   :  { %p1450_p0 = scmp.ne.s32.totalorder %s30_s19, %s1449_s20  ;;  %p1455_p2 = scmp.lt.s32.totalorder %s1449_s20, %s1449_s20 }
   0x8   :  { %p1456_p3 = por %p1455_p2, %p1454_p1 }
   0xa   :  { %p1457_p4 = pnand %p1456_p3, %p1450_p0 }
   0xc   :  { %1460 = shalt.err (!%p1457_p4)
}
   0xd   :  { %s1570_s21 = smov 64   ;;  %s1571_s22 = smov 4  }
   0xe   :  { %35 = dma.hbm_to_vmem [thread:$0]  %s1673_s1, 8192, %s30_s19, [#allocation6], %s1570_s21, %s1570_s21, %s1571_s22  }
   0xf   :  { %s1572_s25 = smov [#allocation8]   ;;  %s1573_s27 = smov [#allocation2]  }
  0x10   :  { %s53_s26 = sshll.u32 %s1572_s25, 4  ;;  %s20_s28 = sshll.u32 %s1573_s27, 4  ;;  %s54_s26 = int_to_ptr.vmem [resolvable:$true] %s53_s26  ;;  %s21_s28 = int_to_ptr.vmem [resolvable:$true] %s20_s28 }
  0x11   :  { %s1469_s29 = scalar_lea.vmem %s54_s26, 1024  ;;  %p1474_p6 = scmp.lt.s32.totalorder %s54_s26, %s54_s26 }
  0x12   :  { %p1470_p5 = scmp.ne.s32.totalorder %s54_s26, %s1469_s29  ;;  %p1475_p7 = scmp.lt.s32.totalorder %s1469_s29, %s1469_s29 }
  0x14   :  { %p1476_p8 = por %p1475_p7, %p1474_p6 }
  0x16   :  { %p1477_p9 = pnand %p1476_p8, %p1470_p5 }
  0x18   :  { %1480 = shalt.err (!%p1477_p9)
}
  0x19   :  { %59 = dma.hbm_to_vmem [thread:$0]  %s1675_s3, 1024, %s54_s26, [#allocation9], %s1570_s21, %s1570_s21, %s1571_s22  }
  0x1a   :  { %s1489_s1 = scalar_lea.vmem %s21_s28, 512  ;;  %p1494_p11 = scmp.lt.s32.totalorder %s21_s28, %s21_s28 }
  0x1b   :  { %p1490_p10 = scmp.ne.s32.totalorder %s21_s28, %s1489_s1  ;;  %p1495_p12 = scmp.lt.s32.totalorder %s1489_s1, %s1489_s1 }
  0x1d   :  { %p1496_p13 = por %p1495_p12, %p1494_p11 }
  0x1f   :  { %p1497_p0 = pnand %p1496_p13, %p1490_p10 }
  0x21   :  { %1500 = shalt.err (!%p1497_p0)
}
  0x22   :  { %23 = dma.hbm_to_vmem [thread:$0]  %s1672_s0, 512, %s21_s28, [#allocation3]  }
  0x23   :  { %s1574_s9 = smov [#allocation7]   ;;  %s1575_s11 = smov [#allocation10]  }
  0x24   :  { %s41_s10 = sshll.u32 %s1574_s9, 4  ;;  %s66_s12 = sshll.u32 %s1575_s11, 4  ;;  %s42_s10 = int_to_ptr.vmem [resolvable:$true] %s41_s10  ;;  %s67_s12 = int_to_ptr.vmem [resolvable:$true] %s66_s12 }
  0x25   :  { %s1509_s13 = scalar_lea.vmem %s42_s10, 1024  ;;  %p1514_p2 = scmp.lt.s32.totalorder %s42_s10, %s42_s10 }
  0x26   :  { %p1510_p1 = scmp.ne.s32.totalorder %s42_s10, %s1509_s13  ;;  %p1515_p3 = scmp.lt.s32.totalorder %s1509_s13, %s1509_s13 }
  0x28   :  { %p1516_p4 = por %p1515_p3, %p1514_p2 }
  0x2a   :  { %p1517_p5 = pnand %p1516_p4, %p1510_p1 }
  0x2c   :  { %1520 = shalt.err (!%p1517_p5)
}
  0x2d   :  { %47 = dma.hbm_to_vmem [thread:$0]  %s1674_s2, 1024, %s42_s10, [#allocation6], %s1570_s21, %s1570_s21, %s1571_s22  }
  0x2e   :  { %s1529_s0 = scalar_lea.vmem %s67_s12, 128  ;;  %p1534_p7 = scmp.lt.s32.totalorder %s67_s12, %s67_s12 }
  0x2f   :  { %p1530_p6 = scmp.ne.s32.totalorder %s67_s12, %s1529_s0  ;;  %p1535_p8 = scmp.lt.s32.totalorder %s1529_s0, %s1529_s0 }
  0x31   :  { %p1536_p9 = por %p1535_p8, %p1534_p7 }
  0x33   :  { %p1537_p10 = pnand %p1536_p9, %p1530_p6 }
  0x35   :  { %1540 = shalt.err (!%p1537_p10)
}
  0x36   :  { %69 = dma.hbm_to_vmem [thread:$0]  %s1676_s4, 128, %s67_s12, [#allocation9]  }
  0x37   :  { %1561 = dma.done.wait [#allocation3], 512  }
  0x38   :  { %1562 = vsyncadd [#allocation3], 4294966784 }
  0x39   :  { %1563 = dma.done.wait [#allocation6], 9216  }
  0x3a   :  { %1564 = vsyncadd [#allocation6], 4294958080 }
  0x3b   :  { %1565 = dma.done.wait [#allocation9], 1152  }
  0x3c   :  { %1566 = vsyncadd [#allocation9], 4294966144  ;;  %v1349_v0 = vld [vmem:[#allocation5 + $0x78] sm:$0xff]   ;;  %v1353_v4 = vld [vmem:[#allocation5 + $0x70] sm:$0xff]   ;;  %vm1577_vm0 = vmmov 0   ;;  %s1578_s2 = smov [#allocation11]  }
  0x3d   :  { %v1350_v1 = vld [vmem:[#allocation5 + $0xf8] sm:$0xff]   ;;  %1193 = vmatprep.subr.bf16.mxu0 %v1349_v0  ;;  %v1354_v5 = vld [vmem:[#allocation5 + $0xf0] sm:$0xff]   ;;  %v1357_v8 = vld [vmem:[#allocation5 + $0x68] sm:$0xff]   ;;  %s1094_s4 = sshll.u32 %s1578_s2, 4  ;;  %s1095_s4 = int_to_ptr.vmem [resolvable:$true] %s1094_s4 }
  0x3e   :  { %v1351_v2 = vld [vmem:[#allocation5 + $0x38] sm:$0xff]   ;;  %1215 = vmatprep.subr.bf16.mxu1 %v1350_v1  ;;  %v1355_v6 = vld [vmem:[#allocation5 + $0x30] sm:$0xff]   ;;  %v1358_v9 = vld [vmem:[#allocation5 + $0xe8] sm:$0xff]   ;;  %s1541_s17 = scalar_lea.vmem %s1095_s4, 128  ;;  %p1546_p12 = scmp.lt.s32.totalorder %s1095_s4, %s1095_s4 }
  0x3f   :  { %v1352_v3 = vld [vmem:[#allocation5 + $0xb8] sm:$0xff]   ;;  %1194 = vmatpush3.bf16.msra.mxu0 %v1351_v2  ;;  %v1356_v7 = vld [vmem:[#allocation5 + $0xb0] sm:$0xff]   ;;  %v1359_v10 = vld [vmem:[#allocation5 + $0x28] sm:$0xff]   ;;  %p1542_p11 = scmp.ne.s32.totalorder %s1095_s4, %s1541_s17  ;;  %p1547_p13 = scmp.lt.s32.totalorder %s1541_s17, %s1541_s17 }
  0x40   :  { %1216 = vmatpush3.bf16.msra.mxu1 %v1352_v3  ;;  %1195 = vmatprep.subr.bf16.mxu0 %v1353_v4  ;;  %v1360_v11 = vld [vmem:[#allocation5 + $0xa8] sm:$0xff]   ;;  %v1361_v12 = vld [vmem:[#allocation5 + $0x60] sm:$0xff]   ;;  %v1365_v16 = vld [vmem:[#allocation5 + $0x58] sm:$0xff]  }
  0x41   :  { %1217 = vmatprep.subr.bf16.mxu1 %v1354_v5  ;;  %v1362_v13 = vld [vmem:[#allocation5 + $0xe0] sm:$0xff]   ;;  %v1366_v17 = vld [vmem:[#allocation5 + $0xd8] sm:$0xff]   ;;  %v1369_v20 = vld [vmem:[#allocation5 + $0x50] sm:$0xff]   ;;  %p1548_p0 = por %p1547_p13, %p1546_p12 }
  0x42   :  { %v1363_v14 = vld [vmem:[#allocation5 + $0x20] sm:$0xff]   ;;  %v1367_v18 = vld [vmem:[#allocation5 + $0x18] sm:$0xff]   ;;  %v1370_v21 = vld [vmem:[#allocation5 + $0xd0] sm:$0xff]  }
  0x43   :  { %1196 = vmatpush3.bf16.msra.mxu0 %v1355_v6  ;;  %v1364_v15 = vld [vmem:[#allocation5 + $0xa0] sm:$0xff]   ;;  %v1368_v19 = vld [vmem:[#allocation5 + $0x98] sm:$0xff]   ;;  %v1371_v22 = vld [vmem:[#allocation5 + $0x10] sm:$0xff]   ;;  %p1549_p1 = pnand %p1548_p0, %p1542_p11 }
  0x44   :  { %1218 = vmatpush3.bf16.msra.mxu1 %v1356_v7  ;;  %1197 = vmatprep.subr.bf16.mxu0 %v1357_v8  ;;  %v1372_v23 = vld [vmem:[#allocation5 + $0x90] sm:$0xff]   ;;  %v1373_v24 = vld [vmem:[#allocation5 + $0x48] sm:$0xff]   ;;  %v1377_v28 = vld [vmem:[#allocation5 + $0x40] sm:$0xff]  }
  0x45   :  { %1219 = vmatprep.subr.bf16.mxu1 %v1358_v9  ;;  %v1374_v25 = vld [vmem:[#allocation5 + $0xc8] sm:$0xff]   ;;  %v1378_v29 = vld [vmem:[#allocation5 + $0xc0] sm:$0xff]   ;;  %v1385_v38 = vld [vmem:[#allocation5 + $0x178] sm:$0xff]  }
  0x46   :  { %v1375_v26 = vld [vmem:[#allocation5 + $0x8] sm:$0xff]   ;;  %v1379_v30 = vld [vmem:[#allocation5] sm:$0xff]   ;;  %v1386_v39 = vld [vmem:[#allocation5 + $0x1f8] sm:$0xff]  }
  0x47   :  { %1198 = vmatpush3.bf16.msra.mxu0 %v1359_v10  ;;  %v1376_v27 = vld [vmem:[#allocation5 + $0x88] sm:$0xff]   ;;  %v1380_v31 = vld [vmem:[#allocation5 + $0x80] sm:$0xff]   ;;  %v1387_v40 = vld [vmem:[#allocation5 + $0x138] sm:$0xff]  }
  0x48   :  { %1220 = vmatpush3.bf16.msra.mxu1 %v1360_v11  ;;  %1199 = vmatprep.subr.bf16.mxu0 %v1361_v12  ;;  %v86_v32 = vld [vmem:[#allocation2] sm:$0xff]  ;;  %v87_v33 = vld [vmem:[#allocation2 + $0x8] sm:$0xff]  ;;  %v1388_v41 = vld [vmem:[#allocation5 + $0x1b8] sm:$0xff]  }
  0x49   :  { %1221 = vmatprep.subr.bf16.mxu1 %v1362_v13  ;;  %v1105_v34 = vcombine.low %v86_v32, %v86_v32  ;;  %v1106_v35 = vcombine.high %v86_v32, %v86_v32  ;;  %v1107_v36 = vcombine.low %v87_v33, %v87_v33  ;;  %v1108_v37 = vcombine.high %v87_v33, %v87_v33  ;;  %v1389_v42 = vld [vmem:[#allocation5 + $0x170] sm:$0xff]   ;;  %v1393_v46 = vld [vmem:[#allocation5 + $0x168] sm:$0xff]   ;;  %v1397_v50 = vld [vmem:[#allocation5 + $0x160] sm:$0xff]  }
  0x4a   :  { %v1390_v43 = vld [vmem:[#allocation5 + $0x1f0] sm:$0xff]   ;;  %v1394_v47 = vld [vmem:[#allocation5 + $0x1e8] sm:$0xff]   ;;  %v1398_v51 = vld [vmem:[#allocation5 + $0x1e0] sm:$0xff]   ;;  %v1576_v13 = vmov 0.0  }
  0x4b   :  { %1200 = vmatpush3.bf16.msra.mxu0 %v1363_v14  ;;  %667 = vmatprep.mubr.bf16.mxu0 %v1106_v35  ;;  %v1391_v44 = vld [vmem:[#allocation5 + $0x130] sm:$0xff]   ;;  %v1395_v48 = vld [vmem:[#allocation5 + $0x128] sm:$0xff]   ;;  %v1399_v52 = vld [vmem:[#allocation5 + $0x120] sm:$0xff]  }
  0x4c   :  { %1222 = vmatpush3.bf16.msra.mxu1 %v1364_v15  ;;  %1201 = vmatprep.subr.bf16.mxu0 %v1365_v16  ;;  %v1392_v45 = vld [vmem:[#allocation5 + $0x1b0] sm:$0xff]   ;;  %v1396_v49 = vld [vmem:[#allocation5 + $0x1a8] sm:$0xff]   ;;  %v1400_v53 = vld [vmem:[#allocation5 + $0x1a0] sm:$0xff]  }
  0x4d   :  { %1223 = vmatprep.subr.bf16.mxu1 %v1366_v17  ;;  %707 = vmatprep.mubr.bf16.mxu1 %v1108_v37  ;;  %v1401_v54 = vld [vmem:[#allocation5 + $0x158] sm:$0xff]   ;;  %v1405_v58 = vld [vmem:[#allocation5 + $0x150] sm:$0xff]   ;;  %v1409_v62 = vld [vmem:[#allocation5 + $0x148] sm:$0xff]  }
  0x4e   :  { %v1402_v55 = vld [vmem:[#allocation5 + $0x1d8] sm:$0xff]   ;;  %v1406_v59 = vld [vmem:[#allocation5 + $0x1d0] sm:$0xff]   ;;  %v1410_v63 = vld [vmem:[#allocation5 + $0x1c8] sm:$0xff]  }
  0x4f   :  { %1202 = vmatpush3.bf16.msra.mxu0 %v1367_v18  ;;  %v1403_v56 = vld [vmem:[#allocation5 + $0x118] sm:$0xff]   ;;  %v1407_v60 = vld [vmem:[#allocation5 + $0x110] sm:$0xff]   ;;  %v1411_v0 = vld [vmem:[#allocation5 + $0x108] sm:$0xff]  }
  0x50   :  { %1224 = vmatpush3.bf16.msra.mxu1 %v1368_v19  ;;  %1203 = vmatprep.subr.bf16.mxu0 %v1369_v20  ;;  %v1404_v57 = vld [vmem:[#allocation5 + $0x198] sm:$0xff]   ;;  %v1408_v61 = vld [vmem:[#allocation5 + $0x190] sm:$0xff]   ;;  %v1412_v1 = vld [vmem:[#allocation5 + $0x188] sm:$0xff]  }
  0x51   :  { %1225 = vmatprep.subr.bf16.mxu1 %v1370_v21  ;;  %v1413_v2 = vld [vmem:[#allocation5 + $0x140] sm:$0xff]   ;;  %v88_v6 = vld [vmem:[#allocation2 + $0x10] sm:$0xff]  ;;  %v89_v9 = vld [vmem:[#allocation2 + $0x18] sm:$0xff] }
  0x52   :  { %v1414_v3 = vld [vmem:[#allocation5 + $0x1c0] sm:$0xff]   ;;  %v1109_v7 = vcombine.low %v88_v6, %v88_v6  ;;  %v1110_v8 = vcombine.high %v88_v6, %v88_v6  ;;  %v1111_v10 = vcombine.low %v89_v9, %v89_v9  ;;  %v1112_v11 = vcombine.high %v89_v9, %v89_v9  ;;  %v1421_v12 = vld [vmem:[#allocation7 + $0x38] sm:$0xff]   ;;  %v1422_v14 = vld [vmem:[#allocation7 + $0x30] sm:$0xff]  }
  0x53   :  { %1204 = vmatpush3.bf16.msra.mxu0 %v1371_v22  ;;  %v1415_v4 = vld [vmem:[#allocation5 + $0x100] sm:$0xff]   ;;  %v1423_v15 = vld [vmem:[#allocation7 + $0x28] sm:$0xff]   ;;  %v1425_v17 = vld [vmem:[#allocation7 + $0x18] sm:$0xff]  }
  0x54   :  { %1226 = vmatpush3.bf16.msra.mxu1 %v1372_v23  ;;  %1205 = vmatprep.subr.bf16.mxu0 %v1373_v24  ;;  %v1416_v5 = vld [vmem:[#allocation5 + $0x180] sm:$0xff]   ;;  %v1426_v18 = vld [vmem:[#allocation7 + $0x10] sm:$0xff]   ;;  %v1427_v19 = vld [vmem:[#allocation7 + $0x8] sm:$0xff]  }
  0x55   :  { %1227 = vmatprep.subr.bf16.mxu1 %v1374_v25  ;;  %v1424_v16 = vld [vmem:[#allocation7 + $0x20] sm:$0xff]  }
  0x56   :  { %v1428_v20 = vld [vmem:[#allocation7] sm:$0xff]  }
  0x57   :  { %1206 = vmatpush3.bf16.msra.mxu0 %v1375_v26  ;;  %v1647_v32 = vld [vmem:[#allocation10] sm:$0xff] }
  0x58   :  { %1228 = vmatpush3.bf16.msra.mxu1 %v1376_v27  ;;  %1207 = vmatprep.subr.bf16.mxu0 %v1377_v28 }
  0x59   :  { %1229 = vmatprep.subr.bf16.mxu1 %v1378_v29  ;;  %v219_v29 = vlaneseq }
  0x5b   :  { %1208 = vmatpush3.bf16.msra.mxu0 %v1379_v30  ;;  %v1644_v30 = vshrl.u32 %v219_v29, 7 }
  0x5c   :  { %1230 = vmatpush3.bf16.msra.mxu1 %v1380_v31  ;;  %1237 = vmatprep.subr.bf16.mxu0 %v1385_v38 }
  0x5d   :  { %1259 = vmatprep.subr.bf16.mxu1 %v1386_v39  ;;  %v221_v31 = vsub.s32 0, %v1644_v30 }
  0x5e   :  { %668 = vmatmul.mubr.bf16.vlgmr.msra.gmra.mxu0 %v1105_v34 }
  0x5f   :  { %708 = vmatmul.mubr.bf16.vlgmr.msra.gmra.mxu1 %v1107_v36  ;;  %1238 = vmatpush3.bf16.msra.mxu0 %v1387_v40  ;;  %v222_v33 = vrot.slane %v1647_v32, %v221_v31 }
  0x60   :  { %1260 = vmatpush3.bf16.msra.mxu1 %v1388_v41  ;;  %1239 = vmatprep.subr.bf16.mxu0 %v1389_v42 }
  0x61   :  { %1261 = vmatprep.subr.bf16.mxu1 %v1390_v43  ;;  %747 = vmatprep.mubr.bf16.mxu0 %v1110_v8  ;;  %v824_v8 = vsub.s32 1, %v1644_v30 }
  0x62   :  { %787 = vmatprep.mubr.bf16.mxu1 %v1112_v11 }
  0x63   :  { %1240 = vmatpush3.bf16.msra.mxu0 %v1391_v44 }
  0x64   :  { %1262 = vmatpush3.bf16.msra.mxu1 %v1392_v45  ;;  %1241 = vmatprep.subr.bf16.mxu0 %v1393_v46 }
  0x65   :  { %1263 = vmatprep.subr.bf16.mxu1 %v1394_v47 }
  0x67   :  { %1242 = vmatpush3.bf16.msra.mxu0 %v1395_v48 }
  0x68   :  { %1264 = vmatpush3.bf16.msra.mxu1 %v1396_v49  ;;  %1243 = vmatprep.subr.bf16.mxu0 %v1397_v50 }
  0x69   :  { %1265 = vmatprep.subr.bf16.mxu1 %v1398_v51 }
  0x6b   :  { %1244 = vmatpush3.bf16.msra.mxu0 %v1399_v52 }
  0x6c   :  { %1266 = vmatpush3.bf16.msra.mxu1 %v1400_v53  ;;  %1245 = vmatprep.subr.bf16.mxu0 %v1401_v54 }
  0x6d   :  { %1267 = vmatprep.subr.bf16.mxu1 %v1402_v55 }
  0x6f   :  { %1246 = vmatpush3.bf16.msra.mxu0 %v1403_v56 }
  0x70   :  { %1268 = vmatpush3.bf16.msra.mxu1 %v1404_v57  ;;  %1247 = vmatprep.subr.bf16.mxu0 %v1405_v58 }
  0x71   :  { %1269 = vmatprep.subr.bf16.mxu1 %v1406_v59 }
  0x73   :  { %1248 = vmatpush3.bf16.msra.mxu0 %v1407_v60 }
  0x74   :  { %1270 = vmatpush3.bf16.msra.mxu1 %v1408_v61  ;;  %1249 = vmatprep.subr.bf16.mxu0 %v1409_v62 }
  0x75   :  { %1271 = vmatprep.subr.bf16.mxu1 %v1410_v63 }
  0x77   :  { %1250 = vmatpush3.bf16.msra.mxu0 %v1411_v0 }
  0x78   :  { %1272 = vmatpush3.bf16.msra.mxu1 %v1412_v1  ;;  %1251 = vmatprep.subr.bf16.mxu0 %v1413_v2 }
  0x79   :  { %1273 = vmatprep.subr.bf16.mxu1 %v1414_v3 }
  0x7b   :  { %1252 = vmatpush3.bf16.msra.mxu0 %v1415_v4 }
  0x7c   :  { %1274 = vmatpush3.bf16.msra.mxu1 %v1416_v5  ;;  %1299 = vmatprep.subr.bf16.mxu0 %v1576_v13 }
  0x7d   :  { %1319 = vmatprep.subr.bf16.mxu1 %v1576_v13 }
  0x7e   :  { %748 = vmatmul.mubr.bf16.vlgmr.msra.gmra.mxu0 %v1109_v7 }
  0x7f   :  { %788 = vmatmul.mubr.bf16.vlgmr.msra.gmra.mxu1 %v1111_v10  ;;  %1300 = vmatpush3.bf16.msra.mxu0 %v1421_v12  ;;  %v829_v12 = vsub.s32 2, %v1644_v30 }
  0x80   :  { %1301 = vmatprep.subr.bf16.mxu0 %v1576_v13  ;;  %1315 = vmatprep.mubr.msk.bf16.mxu0 %vm1577_vm0, %v1576_v13 }
  0x81   :  { %1335 = vmatprep.mubr.msk.bf16.mxu1 %vm1577_vm0, %v1576_v13 }
  0x83   :  { %1302 = vmatpush3.bf16.msra.mxu0 %v1422_v14 }
  0x84   :  { %1303 = vmatprep.subr.bf16.mxu0 %v1576_v13 }
  0x87   :  { %1304 = vmatpush3.bf16.msra.mxu0 %v1423_v15 }
  0x88   :  { %1305 = vmatprep.subr.bf16.mxu0 %v1576_v13 }
  0x8b   :  { %1306 = vmatpush3.bf16.msra.mxu0 %v1424_v16 }
  0x8c   :  { %1307 = vmatprep.subr.bf16.mxu0 %v1576_v13 }
  0x8f   :  { %1308 = vmatpush3.bf16.msra.mxu0 %v1425_v17 }
  0x90   :  { %1309 = vmatprep.subr.bf16.mxu0 %v1576_v13 }
  0x93   :  { %1310 = vmatpush3.bf16.msra.mxu0 %v1426_v18 }
  0x94   :  { %1311 = vmatprep.subr.bf16.mxu0 %v1576_v13 }
  0x97   :  { %1312 = vmatpush3.bf16.msra.mxu0 %v1427_v19  ;;  %v1429_v19 = vld [vmem:[#allocation8 + $0x38] sm:$0xff]  }
  0x98   :  { %1313 = vmatprep.subr.bf16.mxu0 %v1576_v13  ;;  %1320 = vmatpush3.bf16.msra.mxu1 %v1429_v19 }
  0x99   :  { %1321 = vmatprep.subr.bf16.mxu1 %v1576_v13 }
  0x9b   :  { %1314 = vmatpush3.bf16.msra.mxu0 %v1428_v20  ;;  %v1430_v20 = vld [vmem:[#allocation8 + $0x30] sm:$0xff]  }
  0x9c   :  { %1322 = vmatpush3.bf16.msra.mxu1 %v1430_v20 }
  0x9d   :  { %1323 = vmatprep.subr.bf16.mxu1 %v1576_v13 }
 0x11e   :  { %v1209_v21 = vpop.f32.mrf.mxu0 }
 0x11f   :  { %v1231_v22 = vpop.f32.mrf.mxu1 }
 0x120   :  { %v1210_v23 = vpop.f32.mrf.mxu0 }
 0x121   :  { %v1232_v24 = vpop.f32.mrf.mxu1  ;;  %v1211_v34 = vadd.f32 %v1210_v23, %v1209_v21  ;;  %v1431_v21 = vld [vmem:[#allocation8 + $0x28] sm:$0xff]   ;;  %v1433_v23 = vld [vmem:[#allocation8 + $0x18] sm:$0xff]  }
 0x122   :  { %v1212_v25 = vpop.f32.mrf.mxu0  ;;  %v1233_v36 = vadd.f32 %v1232_v24, %v1231_v22  ;;  %1324 = vmatpush3.bf16.msra.mxu1 %v1431_v21  ;;  %v1432_v22 = vld [vmem:[#allocation8 + $0x20] sm:$0xff]   ;;  %v1434_v24 = vld [vmem:[#allocation8 + $0x10] sm:$0xff]  }
 0x123   :  { %v1234_v26 = vpop.f32.mrf.mxu1  ;;  %v670_v35 = vadd.f32 %v1211_v34, %v222_v33  ;;  %1325 = vmatprep.subr.bf16.mxu1 %v1576_v13  ;;  %v1435_v25 = vld [vmem:[#allocation8 + $0x8] sm:$0xff]  }
 0x124   :  { %v1213_v27 = vpop.f32.mrf.mxu0  ;;  %v1436_v26 = vld [vmem:[#allocation8] sm:$0xff]  }
 0x125   :  { %v1235_v28 = vpop.f32.mrf.mxu1  ;;  %v710_v41 = vadd.f32 %v1233_v36, %v670_v35  ;;  %v851_v27 = vsub.s32 3, %v1644_v30 }
 0x126   :  { %1326 = vmatpush3.bf16.msra.mxu1 %v1432_v22 }
 0x127   :  { %1327 = vmatprep.subr.bf16.mxu1 %v1576_v13  ;;  %v852_v28 = vrot.slane %v1647_v32, %v851_v27 }
 0x12a   :  { %1328 = vmatpush3.bf16.msra.mxu1 %v1433_v23 }
 0x12b   :  { %1329 = vmatprep.subr.bf16.mxu1 %v1576_v13 }
 0x12e   :  { %1330 = vmatpush3.bf16.msra.mxu1 %v1434_v24 }
 0x12f   :  { %1331 = vmatprep.subr.bf16.mxu1 %v1576_v13 }
 0x132   :  { %1332 = vmatpush3.bf16.msra.mxu1 %v1435_v25 }
 0x133   :  { %1333 = vmatprep.subr.bf16.mxu1 %v1576_v13 }
 0x136   :  { %1334 = vmatpush3.bf16.msra.mxu1 %v1436_v26 }
 0x13e   :  { %v1253_v37 = vpop.f32.mrf.mxu0 }
 0x13f   :  { %v1275_v38 = vpop.f32.mrf.mxu1 }
 0x140   :  { %v1254_v39 = vpop.f32.mrf.mxu0 }
 0x141   :  { %v1276_v40 = vpop.f32.mrf.mxu1  ;;  %v1255_v42 = vadd.f32 %v1254_v39, %v1253_v37 }
 0x142   :  { %v1256_v43 = vpop.f32.mrf.mxu0  ;;  %v1277_v46 = vadd.f32 %v1276_v40, %v1275_v38 }
 0x143   :  { %v1278_v44 = vpop.f32.mrf.mxu1  ;;  %v750_v45 = vadd.f32 %v1255_v42, %v710_v41 }
 0x144   :  { %v1257_v47 = vpop.f32.mrf.mxu0 }
 0x145   :  { %v1279_v48 = vpop.f32.mrf.mxu1  ;;  %v790_v49 = vadd.f32 %v1277_v46, %v750_v45 }
 0x147   :  { %v795_v50 = vmax.f32 %v790_v49, 0.0 }
 0x149   :  { %v796_v51 = vrot.slane %v795_v50, 4  ;;  %v802_v52 = vmul.f32 %v795_v50, %v795_v50 }
 0x14b   :  { %v797_v53 = vadd.f32 %v796_v51, %v795_v50  ;;  %v803_v54 = vrot.slane %v802_v52, 4 }
 0x14d   :  { %v798_v55 = vrot.slane %v797_v53, 2  ;;  %v804_v56 = vadd.f32 %v803_v54, %v802_v52 }
 0x14f   :  { %v799_v57 = vadd.f32 %v798_v55, %v797_v53  ;;  %v805_v58 = vrot.slane %v804_v56, 2 }
 0x151   :  { %v800_v59 = vrot.slane %v799_v57, 1  ;;  %v806_v60 = vadd.f32 %v805_v58, %v804_v56 }
 0x153   :  { %v801_v61 = vadd.f32 %v800_v59, %v799_v57  ;;  %v807_v62 = vrot.slane %v806_v60, 1  ;;  %v970_v57 = vsub.s32 4, %v1644_v30 }
 0x155   :  { %v808_v63 = vadd.f32 %v807_v62, %v806_v60  ;;  %v809_v0 = vmul.f32 0.125, %v801_v61  ;;  %v975_v61 = vsub.s32 5, %v1644_v30 }
 0x157   :  { %v810_v1 = vmul.f32 0.125, %v808_v63  ;;  %v811_v2 = vmul.f32 %v809_v0, %v809_v0 }
 0x159   :  { %v812_v3 = vsub.f32 %v810_v1, %v811_v2 }
 0x15b   :  { %v813_v4 = vmax.f32 %v812_v3, 0.0  ;;  %v997_v3 = vsub.s32 6, %v1644_v30 }
 0x15d   :  { %v814_v5 = vadd.f32 1e-05, %v813_v4  ;;  %v998_v4 = vrot.slane %v1647_v32, %v997_v3 }
 0x15f   :  { %1437 = vrsqrt.f32 %v814_v5 }
 0x16c   :  { %v1438_v6 = vpop.eup %1437 }
 0x16d   :  { %v816_v7 = vmul.f32 %v1438_v6, %v1647_v32 }
 0x16f   :  { %v817_v9 = vmul.f32 %v816_v7, %v809_v0  ;;  %v825_v11 = vrot.slane %v816_v7, %v824_v8 }
 0x171   :  { %v819_v10 = vrot.slane %v817_v9, 7  ;;  %v826_v15 = vmul.f32 %v825_v11, %v795_v50 }
 0x173   :  { %v821_v14 = vsub.f32 %v1647_v32, %v819_v10 }
 0x175   :  { %v830_v16 = vrot.slane %v821_v14, %v829_v12 }
 0x177   :  { %v831_v17 = vadd.f32 %v830_v16, %v826_v15 }
 0x179   :  { %v832_v18 = vpack.c.bf16 %v831_v17, %v831_v17 }
 0x17b   :  { %1316 = vmatmul.mubr.bf16.vlgmr.msra.gmra.mxu0 %v832_v18 }
 0x23b   :  { %v935_v29 = vpop.f32.mrf.mxu0 }
 0x23c   :  { %v936_v31 = vadd.f32 %v935_v29, %v852_v28 }
 0x23d   :  { %v1317_v33 = vpop.f32.mrf.mxu0 }
 0x23e   :  { %v941_v34 = vmax.f32 %v936_v31, 0.0 }
 0x23f   :  { %v938_v35 = vpop.f32.mrf.mxu0 }
 0x240   :  { %v942_v36 = vrot.slane %v941_v34, 4  ;;  %v948_v37 = vmul.f32 %v941_v34, %v941_v34 }
 0x241   :  { %v1318_v38 = vpop.f32.mrf.mxu0 }
 0x242   :  { %v943_v39 = vadd.f32 %v942_v36, %v941_v34  ;;  %v949_v40 = vrot.slane %v948_v37, 4 }
 0x244   :  { %v944_v41 = vrot.slane %v943_v39, 2  ;;  %v950_v42 = vadd.f32 %v949_v40, %v948_v37 }
 0x246   :  { %v945_v43 = vadd.f32 %v944_v41, %v943_v39  ;;  %v951_v44 = vrot.slane %v950_v42, 2 }
 0x248   :  { %v946_v13 = vrot.slane %v945_v43, 1  ;;  %v952_v45 = vadd.f32 %v951_v44, %v950_v42 }
 0x24a   :  { %v947_v46 = vadd.f32 %v946_v13, %v945_v43  ;;  %v953_v47 = vrot.slane %v952_v45, 1 }
 0x24c   :  { %v954_v48 = vadd.f32 %v953_v47, %v952_v45  ;;  %v955_v49 = vmul.f32 0.125, %v947_v46 }
 0x24e   :  { %v956_v50 = vmul.f32 0.125, %v954_v48  ;;  %v957_v51 = vmul.f32 %v955_v49, %v955_v49 }
 0x250   :  { %v958_v52 = vsub.f32 %v956_v50, %v957_v51 }
 0x252   :  { %v959_v53 = vmax.f32 %v958_v52, 0.0 }
 0x254   :  { %v960_v54 = vadd.f32 1e-05, %v959_v53 }
 0x256   :  { %1439 = vrsqrt.f32 %v960_v54 }
 0x263   :  { %v1440_v55 = vpop.eup %1439 }
 0x264   :  { %v962_v56 = vmul.f32 %v1440_v55, %v1647_v32 }
 0x266   :  { %v963_v58 = vmul.f32 %v962_v56, %v955_v49  ;;  %v971_v59 = vrot.slane %v962_v56, %v970_v57 }
 0x268   :  { %v965_v60 = vrot.slane %v963_v58, 7  ;;  %v972_v63 = vmul.f32 %v971_v59, %v941_v34 }
 0x26a   :  { %v967_v62 = vsub.f32 %v1647_v32, %v965_v60 }
 0x26c   :  { %v976_v0 = vrot.slane %v967_v62, %v975_v61 }
 0x26e   :  { %v977_v1 = vadd.f32 %v976_v0, %v972_v63 }
 0x270   :  { %v978_v2 = vpack.c.bf16 %v977_v1, %v977_v1 }
 0x272   :  { %1336 = vmatmul.mubr.bf16.vlgmr.msra.gmra.mxu1 %v978_v2 }
 0x332   :  { %v1081_v5 = vpop.f32.mrf.mxu1 }
 0x333   :  { %v1082_v6 = vadd.f32 %v1081_v5, %v998_v4 }
 0x334   :  { %v1337_v7 = vpop.f32.mrf.mxu1 }
 0x335   :  { %1087 = vst [vmem:[#allocation11] sm:$0xff] %v1082_v6 }
 0x336   :  { %v1084_v8 = vpop.f32.mrf.mxu1 }
 0x337   :  { %1552 = shalt.err (!%p1549_p1)
}
 0x338   :  { %1097 = dma.vmem_to_hbm [thread:$0]  %s1095_s4, 128, %s1677_s5, [#allocation4]   ;;  %v1338_v30 = vpop.f32.mrf.mxu1 }
 0x339   :  { %1567 = dma.done.wait [#allocation4], 128  }
 0x33a   :  { %1568 = vsyncadd [#allocation4], 4294967168 }
 0x33b   :  { %1101 = vsyncpa [#allocation3], 1 }
 0x33c   :  { %1102 = vsyncpa [#allocation6], 1 }
 0x33d   :  { %1103 = vsyncpa [#allocation9], 1 }
 0x33e   :  { %1104 = vsyncpa [#allocation4], 1 }

</bundles_post_ra>
